<compile_context>
chip_gen: v6e
topology: v6e:2x2x1
jax: 0.10.0
libtpu: 0.0.40
codegen_flags: <defaults>
</compile_context>

<pallas_src>
import functools
import math

import jax
import jax.numpy as jnp
from jax.experimental import pallas as pl
from jax.experimental.pallas import tpu as pltpu


def _generator_output_kernel(x_ref, w_ref, b_ref, o_ref):
    # x_ref: (TM, H)   w_ref: (H, V)   b_ref: (1, V)   o_ref: (TM, V)
    logits = jnp.dot(x_ref[...], w_ref[...],
                     preferred_element_type=jnp.float32)          # MXU, fp32 acc
    logits = logits + b_ref[...].astype(jnp.float32)              # VPU broadcast add

    # Numerically stable log_softmax along the vocab (lane) axis.
    m = jnp.max(logits, axis=-1, keepdims=True)                   # XLU reduce
    shifted = logits - m
    lse = jnp.log(jnp.sum(jnp.exp(shifted), axis=-1, keepdims=True))  # EUP + XLU
    o_ref[...] = (shifted - lse).astype(o_ref.dtype)


@functools.partial(jax.jit, static_argnames=("row_tile",))
def generator_output(x, weight, bias, *, row_tile=256):
    """log_softmax(x @ weight.T + bias, axis=-1).

    x:      (B, S, H)
    weight: (V, H)    (PyTorch nn.Linear layout)
    bias:   (V,)
    returns (B, S, V) in x.dtype

    row_tile: rows of the flattened (B*S, H) input processed per grid step
              (clamped / rounded to the sublane multiple of 8).
    """
    B, S, H = x.shape
    V = weight.shape[0]
    N = B * S

    # Round the row count up to a sublane multiple of 8; clamp the tile so
    # tiny inputs run in one grid step and big inputs pipeline.
    n_pad = pl.cdiv(N, 8) * 8
    tm = min(max(8, (row_tile // 8) * 8), n_pad)
    n_pad = pl.cdiv(n_pad, tm) * tm
    n_tiles = n_pad // tm

    x2 = x.reshape(N, H)
    if n_pad != N:
        x2 = jnp.pad(x2, ((0, n_pad - N), (0, 0)))

    w_t = weight.T               # (H, V): vocab on the lane (fast) axis
    b2 = bias.reshape(1, V)

    out = pl.pallas_call(
        _generator_output_kernel,
        out_shape=jax.ShapeDtypeStruct((n_pad, V), x.dtype),
        grid_spec=pltpu.PrefetchScalarGridSpec(
            num_scalar_prefetch=0,
            grid=(n_tiles,),
            in_specs=[
                pl.BlockSpec((tm, H), lambda i: (i, 0)),   # x rows (pipelined)
                pl.BlockSpec((H, V), lambda i: (0, 0)),    # weight (resident)
                pl.BlockSpec((1, V), lambda i: (0, 0)),    # bias   (resident)
            ],
            out_specs=pl.BlockSpec((tm, V), lambda i: (i, 0)),
        ),
        compiler_params=pltpu.CompilerParams(
            dimension_semantics=("parallel",),
            vmem_limit_bytes=64 << 20,
        ),
    )(x2, w_t, b2)

    return out[:N].reshape(B, S, V)


if __name__ == "__main__":
    # Small shapes consistent with the module's forward.
    batch, seq, hidden, vocab_size = 2, 8, 32, 512

    key = jax.random.PRNGKey(0)
    k_x, k_w, k_b = jax.random.split(key, 3)

    x = jax.random.normal(k_x, (batch, seq, hidden), jnp.float32)

    # nn.Linear default init: U(-1/sqrt(H), 1/sqrt(H)).
    bound = 1.0 / math.sqrt(hidden)
    weight = jax.random.uniform(k_w, (vocab_size, hidden), jnp.float32,
                                minval=-bound, maxval=bound)
    bias = jax.random.uniform(k_b, (vocab_size,), jnp.float32,
                              minval=-bound, maxval=bound)

    out = generator_output(x, weight, bias)
    out = jax.block_until_ready(out)

    # Pure-JAX reference: log_softmax(x @ W.T + b).
    ref = jax.nn.log_softmax(
        jnp.einsum("bsh,vh->bsv", x, weight) + bias, axis=-1)

    assert out.shape == (batch, seq, vocab_size)
    assert jnp.allclose(out, ref, atol=1e-4, rtol=1e-4), "mismatch vs reference"

    print("KERNEL_OK")
</pallas_src>

<mosaic_0001>
module attributes {stable_mosaic.version = 11 : i64} {
  func.func @_generator_output_kernel(%arg0: i32, %arg1: memref<16x32xf32, #tpu.memory_space<vmem>>, %arg2: memref<32x512xf32, #tpu.memory_space<vmem>>, %arg3: memref<1x512xf32, #tpu.memory_space<vmem>>, %arg4: memref<16x512xf32, #tpu.memory_space<vmem>>) attributes {dimension_semantics = [#tpu.dimension_semantics<parallel>], iteration_bounds = array<i64: 1>, scalar_prefetch = 0 : i64, scratch_operands = 0 : i64, tpu.core_type = #tpu.core_type<tc>, window_params = [{transform_indices = @transform_0, window_bounds = array<i64: 16, 32>}, {pipeline_mode = #tpu.pipeline_mode<synchronous>, transform_indices = @transform_1, window_bounds = array<i64: 32, 512>}, {pipeline_mode = #tpu.pipeline_mode<synchronous>, transform_indices = @transform_2, window_bounds = array<i64: 1, 512>}, {transform_indices = @transform_3, window_bounds = array<i64: 16, 512>}]} {
    %c0 = arith.constant 0 : index
    %c0_0 = arith.constant 0 : index
    %0 = vector.load %arg1[%c0, %c0_0] : memref<16x32xf32, #tpu.memory_space<vmem>>, vector<16x32xf32>
    %c0_1 = arith.constant 0 : index
    %c0_2 = arith.constant 0 : index
    %1 = vector.load %arg2[%c0_1, %c0_2] : memref<32x512xf32, #tpu.memory_space<vmem>>, vector<32x512xf32>
    %cst = arith.constant dense<0.000000e+00> : vector<16x512xf32>
    %2 = tpu.matmul %0, %1, %cst {dimension_numbers = #tpu.dot_dimension_numbers<[1], [0], [0], [1], [0, 0, 1, 1], [], []>} : vector<16x32xf32>, vector<32x512xf32>, vector<16x512xf32> -> vector<16x512xf32>
    %c0_3 = arith.constant 0 : index
    %c0_4 = arith.constant 0 : index
    %3 = vector.load %arg3[%c0_3, %c0_4] : memref<1x512xf32, #tpu.memory_space<vmem>>, vector<1x512xf32>
    %4 = vector.broadcast %3 : vector<1x512xf32> to vector<16x512xf32>
    %5 = arith.addf %2, %4 : vector<16x512xf32>
    %cst_5 = arith.constant dense<0xFF800000> : vector<16xf32>
    %6 = vector.multi_reduction <maximumf>, %5, %cst_5 [1] : vector<16x512xf32> to vector<16xf32>
    %7 = vector.shape_cast %6 : vector<16xf32> to vector<16x1xf32>
    %8 = vector.broadcast %7 : vector<16x1xf32> to vector<16x512xf32>
    %9 = arith.subf %5, %8 : vector<16x512xf32>
    %10 = math.exp %9 : vector<16x512xf32>
    %cst_6 = arith.constant dense<0.000000e+00> : vector<16xf32>
    %11 = vector.multi_reduction <add>, %10, %cst_6 [1] : vector<16x512xf32> to vector<16xf32>
    %12 = vector.shape_cast %11 : vector<16xf32> to vector<16x1xf32>
    %13 = math.log %12 : vector<16x1xf32>
    %14 = vector.broadcast %13 : vector<16x1xf32> to vector<16x512xf32>
    %15 = arith.subf %9, %14 : vector<16x512xf32>
    %c0_7 = arith.constant 0 : index
    %c0_8 = arith.constant 0 : index
    %16 = vector.load %arg4[%c0_7, %c0_8] : memref<16x512xf32, #tpu.memory_space<vmem>>, vector<16x512xf32>
    tpu.vector_store %arg4[%c0_7, %c0_8], %15 {strides = array<i32>} : memref<16x512xf32, #tpu.memory_space<vmem>>, vector<16x512xf32>,
    return
  }
  func.func @transform_0(%arg0: i32) -> (i32, i32) {
    %c0_i32 = arith.constant 0 : i32
    %c0_i32_0 = arith.constant 0 : i32
    return %arg0, %c0_i32 : i32, i32
  }
  func.func @transform_1(%arg0: i32) -> (i32, i32) {
    %c0_i32 = arith.constant 0 : i32
    %c0_i32_0 = arith.constant 0 : i32
    %c0_i32_1 = arith.constant 0 : i32
    return %c0_i32, %c0_i32_0 : i32, i32
  }
  func.func @transform_2(%arg0: i32) -> (i32, i32) {
    %c0_i32 = arith.constant 0 : i32
    %c0_i32_0 = arith.constant 0 : i32
    %c0_i32_1 = arith.constant 0 : i32
    return %c0_i32, %c0_i32_0 : i32, i32
  }
  func.func @transform_3(%arg0: i32) -> (i32, i32) {
    %c0_i32 = arith.constant 0 : i32
    %c0_i32_0 = arith.constant 0 : i32
    return %arg0, %c0_i32 : i32, i32
  }
}

</mosaic_0001>

<bundles_post_ra>
// kernel: generator_output.1
= control target key start
LH: loop header
LB: loop body
LE: loop exit
PB: predicated region body
PF: predicated region fallthrough
CT: control target
= control target key end

     0   :  { %8 = vsyncpa [#allocation3], 0  ;;  %s470_s0 = inlined_call_operand.hbm [shape: f32[16,32], index: 0, kind: input, shape index: {}]   ;;  %s471_s1 = inlined_call_operand.hbm [shape: f32[32,512], index: 1, kind: input, shape index: {}]   ;;  %s472_s2 = inlined_call_operand.vmem [shape: f32[1,512], index: 2, kind: input, shape index: {}]   ;;  %s473_s3 = inlined_call_operand.hbm [shape: f32[16,512], index: 3, kind: output, shape index: {}]  }
   0x1   :  { %9 = vsyncpa [#allocation6], 0 }
   0x2   :  { %10 = vsyncpa [#allocation4], 0  ;;  %s424_s12 = smov [#allocation2]  }
   0x3   :  { %s16_s13 = sshll.u32 %s424_s12, 4  ;;  %s17_s13 = int_to_ptr.vmem [resolvable:$true] %s16_s13 }
   0x4   :  { %s366_s14 = scalar_lea.vmem %s17_s13, 256  ;;  %p371_p1 = scmp.lt.s32.totalorder %s17_s13, %s17_s13 }
   0x5   :  { %p367_p0 = scmp.ne.s32.totalorder %s17_s13, %s366_s14  ;;  %p372_p2 = scmp.lt.s32.totalorder %s366_s14, %s366_s14 }
   0x7   :  { %p373_p3 = por %p372_p2, %p371_p1 }
   0x9   :  { %p374_p4 = pnand %p373_p3, %p367_p0 }
   0xb   :  { %377 = shalt.err (!%p374_p4)
}
   0xc   :  { %s425_s15 = smov 128   ;;  %s426_s16 = smov 8  }
   0xd   :  { %22 = dma.hbm_to_vmem [thread:$0]  %s470_s0, 256, %s17_s13, [#allocation3], %s425_s15, %s425_s15, %s426_s16  }
   0xe   :  { %s427_s19 = smov [#allocation5]  }
   0xf   :  { %s28_s20 = sshll.u32 %s427_s19, 4  ;;  %s29_s20 = int_to_ptr.vmem [resolvable:$true] %s28_s20 }
  0x10   :  { %s386_s21 = scalar_lea.vmem %s29_s20, 2048  ;;  %p391_p6 = scmp.lt.s32.totalorder %s29_s20, %s29_s20 }
  0x11   :  { %p387_p5 = scmp.ne.s32.totalorder %s29_s20, %s386_s21  ;;  %p392_p7 = scmp.lt.s32.totalorder %s386_s21, %s386_s21 }
  0x13   :  { %p393_p8 = por %p392_p7, %p391_p6 }
  0x15   :  { %p394_p9 = pnand %p393_p8, %p387_p5 }
  0x17   :  { %397 = shalt.err (!%p394_p9)
}
  0x18   :  { %s428_s22 = smov 512   ;;  %s429_s23 = smov 32  }
  0x19   :  { %34 = dma.hbm_to_vmem [thread:$0]  %s471_s1, 2048, %s29_s20, [#allocation6], %s428_s22, %s428_s22, %s429_s23  }
  0x1a   :  { %418 = dma.done.wait [#allocation3], 256  }
  0x1b   :  { %419 = vsyncadd [#allocation3], 4294967040 }
  0x1c   :  { %420 = dma.done.wait [#allocation6], 2048  }
  0x1d   :  { %421 = vsyncadd [#allocation6], 4294965248  ;;  %v430_v0 = vmov 0.0   ;;  %v58_v1 = vld [vmem:[#allocation5 + $0x68] sm:$0xff]  ;;  %v60_v2 = vld [vmem:[#allocation5 + $0x78] sm:$0xff]  ;;  %vm83_vm0 = vcmask 261120   ;;  %v63_v19 = vlaneseq }
  0x1e   :  { %154 = vmatprep.mubr.f32.mxu0 %v430_v0  ;;  %231 = vmatprep.mubr.f32.mxu1 %v430_v0  ;;  %v57_v3 = vld [vmem:[#allocation5 + $0x60] sm:$0xff]  ;;  %v59_v4 = vld [vmem:[#allocation5 + $0x70] sm:$0xff]  ;;  %v54_v5 = vld [vmem:[#allocation5 + $0x48] sm:$0xff] }
  0x1f   :  { %114 = vmatprep.subr.mxu0 %v58_v1  ;;  %191 = vmatprep.subr.mxu1 %v60_v2  ;;  %v56_v6 = vld [vmem:[#allocation5 + $0x58] sm:$0xff]  ;;  %v53_v7 = vld [vmem:[#allocation5 + $0x40] sm:$0xff]  ;;  %v55_v8 = vld [vmem:[#allocation5 + $0x50] sm:$0xff]  ;;  %v64_v20 = vshrl.u32 %v63_v19, 7 }
  0x20   :  { %115 = vmatpush1.msra.mxu0 %v57_v3  ;;  %192 = vmatpush1.msra.mxu1 %v59_v4  ;;  %v50_v9 = vld [vmem:[#allocation5 + $0x28] sm:$0xff]  ;;  %v52_v10 = vld [vmem:[#allocation5 + $0x38] sm:$0xff]  ;;  %v49_v11 = vld [vmem:[#allocation5 + $0x20] sm:$0xff] }
  0x21   :  { %116 = vmatprep.subr.mxu0 %v54_v5  ;;  %193 = vmatprep.subr.mxu1 %v56_v6  ;;  %v51_v12 = vld [vmem:[#allocation5 + $0x30] sm:$0xff]  ;;  %v46_v13 = vld [vmem:[#allocation5 + $0x8] sm:$0xff]  ;;  %v48_v14 = vld [vmem:[#allocation5 + $0x18] sm:$0xff]  ;;  %v65_v21 = vsub.s32 0, %v64_v20  ;;  %v73_v22 = vsub.s32 2, %v64_v20  ;;  %v69_v24 = vsub.s32 1, %v64_v20 }
  0x22   :  { %117 = vmatpush1.msra.mxu0 %v53_v7  ;;  %194 = vmatpush1.msra.mxu1 %v55_v8  ;;  %v45_v15 = vld [vmem:[#allocation5] sm:$0xff]  ;;  %v47_v16 = vld [vmem:[#allocation5 + $0x10] sm:$0xff]  ;;  %v44_v18 = vld [vmem:[#allocation2 + $0x8] sm:$0xff]  ;;  %v77_v25 = vsub.s32 3, %v64_v20 }
  0x23   :  { %118 = vmatprep.subr.mxu0 %v50_v9  ;;  %195 = vmatprep.subr.mxu1 %v52_v10  ;;  %v43_v17 = vld [vmem:[#allocation2] sm:$0xff] }
  0x24   :  { %119 = vmatpush1.msra.mxu0 %v49_v11  ;;  %196 = vmatpush1.msra.mxu1 %v51_v12  ;;  %v61_v23 = vld [vmem:[%s472_s2] sm:$0xf]  ;;  %s431_s2 = smov [#allocation7]  }
  0x25   :  { %120 = vmatprep.subr.mxu0 %v46_v13  ;;  %197 = vmatprep.subr.mxu1 %v48_v14  ;;  %v66_v26 = vrot.slane %v61_v23, %v65_v21  ;;  %v74_v27 = vrot.slane %v61_v23, %v73_v22  ;;  %v70_v28 = vrot.slane %v61_v23, %v69_v24  ;;  %s313_s26 = sshll.u32 %s431_s2, 4  ;;  %s314_s26 = int_to_ptr.vmem [resolvable:$true] %s313_s26 }
  0x26   :  { %121 = vmatpush1.msra.mxu0 %v45_v15  ;;  %198 = vmatpush1.msra.mxu1 %v47_v16  ;;  %v78_v29 = vrot.slane %v61_v23, %v77_v25  ;;  %s398_s27 = scalar_lea.vmem %s314_s26, 1024  ;;  %p403_p11 = scmp.lt.s32.totalorder %s314_s26, %s314_s26 }
  0x27   :  { %326 = vmatmul.mubr.msk.f32.vlgmr.msra.gmra.mxu0 %vm83_vm0, %v43_v17  ;;  %328 = vmatmul.mubr.msk.f32.vlgmr.msra.gmra.mxu1 %vm83_vm0, %v43_v17  ;;  %p399_p10 = scmp.ne.s32.totalorder %s314_s26, %s398_s27  ;;  %p404_p12 = scmp.lt.s32.totalorder %s398_s27, %s398_s27 }
  0x28   :  { %160 = vmatprep.mubr.f32.mxu0 %v430_v0  ;;  %237 = vmatprep.mubr.f32.mxu1 %v430_v0 }
  0x29   :  { %p405_p13 = por %p404_p12, %p403_p11 }
  0x2b   :  { %327 = vmatmul.mubr.msk.f32.gmra.mxu0 %vm83_vm0, %v44_v18  ;;  %329 = vmatmul.mubr.msk.f32.gmra.mxu1 %vm83_vm0, %v44_v18  ;;  %p406_p0 = pnand %p405_p13, %p399_p10 }
  0xe7   :  { %v156_v30 = vpop.f32.mrf.mxu0  ;;  %v233_v31 = vpop.f32.mrf.mxu1 }
  0xe8   :  { %v157_v32 = vadd.f32 %v156_v30, %v66_v26  ;;  %v234_v33 = vadd.f32 %v233_v31, %v74_v27 }
  0xe9   :  { %v158_v34 = vpop.f32.mrf.mxu0  ;;  %v235_v35 = vpop.f32.mrf.mxu1 }
  0xea   :  { %v159_v36 = vadd.f32 %v158_v34, %v70_v28  ;;  %v236_v37 = vadd.f32 %v235_v35, %v78_v29  ;;  %v244_v42 = vmax.f32 %v157_v32, %v234_v33 }
  0xeb   :  { %v162_v38 = vpop.f32.mrf.mxu0  ;;  %v239_v39 = vpop.f32.mrf.mxu1 }
  0xec   :  { %v163_v40 = vadd.f32 %v162_v38, %v66_v26  ;;  %v240_v41 = vadd.f32 %v239_v39, %v74_v27  ;;  %v245_v43 = vmax.f32 %v159_v36, %v236_v37 }
  0xed   :  { %v164_v44 = vpop.f32.mrf.mxu0  ;;  %v241_v45 = vpop.f32.mrf.mxu1 }
  0xee   :  { %v165_v46 = vadd.f32 %v164_v44, %v70_v28  ;;  %v242_v47 = vadd.f32 %v241_v45, %v78_v29  ;;  %v246_v48 = vmax.f32 %v244_v42, %v245_v43  ;;  %v249_v49 = vmax.f32 %v163_v40, %v240_v41 }
  0xf0   :  { %v250_v50 = vmax.f32 %v165_v46, %v242_v47  ;;  %247 = vmax.xlane.f32.xlu0 %v246_v48 }
  0xf2   :  { %v251_v51 = vmax.f32 %v249_v49, %v250_v50 }
  0xf4   :  { %252 = vmax.xlane.f32.xlu0 %v251_v51 }
 0x179   :  { %v248_v52 = vpop.xlane.xlu0 %247 }
 0x17a   :  { %v254_v53 = vsub.f32 %v157_v32, %v248_v52  ;;  %v255_v54 = vsub.f32 %v159_v36, %v248_v52  ;;  %v256_v55 = vsub.f32 %v234_v33, %v248_v52  ;;  %v257_v56 = vsub.f32 %v236_v37, %v248_v52 }
 0x17c   :  { %v262_v57 = vmul.f32 1.442695, %v254_v53  ;;  %v264_v58 = vmul.f32 1.442695, %v255_v54  ;;  %v266_v59 = vmul.f32 1.442695, %v256_v55 }
 0x17d   :  { %v268_v60 = vmul.f32 1.442695, %v257_v56  ;;  %v253_v61 = vpop.xlane.xlu0 %252 }
 0x17e   :  { %338 = vpow2.f32 %v262_v57  ;;  %v258_v62 = vsub.f32 %v163_v40, %v253_v61  ;;  %v259_v63 = vsub.f32 %v165_v46, %v253_v61  ;;  %v260_v0 = vsub.f32 %v240_v41, %v253_v61 }
 0x17f   :  { %340 = vpow2.f32 %v264_v58  ;;  %v261_v1 = vsub.f32 %v242_v47, %v253_v61 }
 0x180   :  { %342 = vpow2.f32 %v266_v59  ;;  %v270_v2 = vmul.f32 1.442695, %v258_v62  ;;  %v272_v3 = vmul.f32 1.442695, %v259_v63  ;;  %v274_v4 = vmul.f32 1.442695, %v260_v0 }
 0x181   :  { %344 = vpow2.f32 %v268_v60  ;;  %v276_v5 = vmul.f32 1.442695, %v261_v1 }
 0x182   :  { %346 = vpow2.f32 %v270_v2 }
 0x183   :  { %348 = vpow2.f32 %v272_v3 }
 0x184   :  { %350 = vpow2.f32 %v274_v4 }
 0x185   :  { %352 = vpow2.f32 %v276_v5 }
 0x18b   :  { %v339_v6 = vpop.eup %338 }
 0x18c   :  { %v341_v7 = vpop.eup %340 }
 0x18d   :  { %v343_v8 = vpop.eup %342  ;;  %v278_v9 = vadd.f32 %v341_v7, %v339_v6 }
 0x18e   :  { %v345_v10 = vpop.eup %344 }
 0x18f   :  { %v347_v11 = vpop.eup %346  ;;  %v279_v12 = vadd.f32 %v343_v8, %v278_v9 }
 0x190   :  { %v349_v13 = vpop.eup %348 }
 0x191   :  { %v280_v14 = vadd.f32 %v345_v10, %v279_v12  ;;  %v283_v15 = vadd.f32 %v349_v13, %v347_v11  ;;  %v351_v16 = vpop.eup %350 }
 0x192   :  { %v353_v18 = vpop.eup %352 }
 0x193   :  { %281 = vadd.xlane.f32.xlu1 %v280_v14  ;;  %v284_v17 = vadd.f32 %v351_v16, %v283_v15 }
 0x195   :  { %v285_v19 = vadd.f32 %v353_v18, %v284_v17 }
 0x197   :  { %286 = vadd.xlane.f32.xlu1 %v285_v19 }
 0x21c   :  { %v282_v20 = vpop.xlane.xlu1 %281 }
 0x21d   :  { %354 = vlog2.f32 %v282_v20 }
 0x220   :  { %v287_v21 = vpop.xlane.xlu1 %286 }
 0x221   :  { %356 = vlog2.f32 %v287_v21 }
 0x22a   :  { %v355_v22 = vpop.eup %354 }
 0x22b   :  { %v289_v23 = vmul.f32 0.6931472, %v355_v22 }
 0x22d   :  { %v292_v24 = vsub.f32 %v254_v53, %v289_v23  ;;  %v293_v25 = vsub.f32 %v255_v54, %v289_v23  ;;  %v294_v26 = vsub.f32 %v256_v55, %v289_v23  ;;  %v295_v27 = vsub.f32 %v257_v56, %v289_v23 }
 0x22e   :  { %v357_v28 = vpop.eup %356 }
 0x22f   :  { %300 = vst [vmem:[#allocation7] sm:$0xff] %v292_v24  ;;  %301 = vst [vmem:[#allocation7 + $0x8] sm:$0xff] %v293_v25  ;;  %v291_v29 = vmul.f32 0.6931472, %v357_v28 }
 0x230   :  { %302 = vst [vmem:[#allocation7 + $0x10] sm:$0xff] %v294_v26  ;;  %303 = vst [vmem:[#allocation7 + $0x18] sm:$0xff] %v295_v27 }
 0x231   :  { %v296_v30 = vsub.f32 %v258_v62, %v291_v29  ;;  %v297_v31 = vsub.f32 %v259_v63, %v291_v29  ;;  %v298_v32 = vsub.f32 %v260_v0, %v291_v29  ;;  %v299_v33 = vsub.f32 %v261_v1, %v291_v29 }
 0x233   :  { %304 = vst [vmem:[#allocation7 + $0x20] sm:$0xff] %v296_v30  ;;  %305 = vst [vmem:[#allocation7 + $0x28] sm:$0xff] %v297_v31 }
 0x234   :  { %306 = vst [vmem:[#allocation7 + $0x30] sm:$0xff] %v298_v32  ;;  %307 = vst [vmem:[#allocation7 + $0x38] sm:$0xff] %v299_v33 }
 0x235   :  { %409 = shalt.err (!%p406_p0)
}
 0x236   :  { %319 = dma.vmem_to_hbm [thread:$0]  %s314_s26, 1024, %s473_s3, [#allocation4], %s428_s22, %s428_s22, %s429_s23  }
 0x237   :  { %422 = dma.done.wait [#allocation4], 1024  }
 0x238   :  { %423 = vsyncadd [#allocation4], 4294966272 }
 0x239   :  { %323 = vsyncpa [#allocation3], 1 }
 0x23a   :  { %324 = vsyncpa [#allocation6], 1 }
 0x23b   :  { %325 = vsyncpa [#allocation4], 1 }

</bundles_post_ra>
